<compile_context>
chip_gen: v6e
topology: v6e:2x2x1
jax: 0.10.0
libtpu: 0.0.40
codegen_flags: <defaults>
</compile_context>

<pallas_src>
import jax
import jax.numpy as jnp
from jax.experimental import pallas as pl
from jax.experimental.pallas import tpu as pltpu


_LANE_UNIT = 128                  # vreg lane width
_LANE_TARGET_BYTES = 256 * 1024   # lane-block (last-dim) byte budget
_BLOCK_TARGET_BYTES = 2 << 20     # ~2 MiB per image per grid step
_MIN_GRID_STEPS = 2               # keep both v7x TensorCores busy


def _round_up(x, m):
    return ((x + m - 1) // m) * m


def _row_unit(itemsize):
    # Packed sublane tile height: 8 for 4-byte, 16 for 2-byte, 32 for 1-byte dtypes.
    return max(8, 32 // int(itemsize))


def _vmem_budget_bytes():
    """Budget for ALL pipelined image buffers (in+out, double-buffered)."""
    try:
        cap = int(pltpu.get_tpu_info().vmem_capacity_bytes)
    except Exception:
        cap = 64 << 20  # conservative: v7x per-TensorCore VMEM
    return min(cap // 4, 16 << 20)


def _largest_divisor_multiple(total, unit, cap):
    """Largest d with: d divides `total`, d % unit == 0, d <= cap; else None."""
    cap = min(cap, total)
    d = cap - (cap % unit)
    while d >= unit:
        if total % d == 0:
            return d
        d -= unit
    return None


def _pick_block(extent, unit, cap):
    """Block size along one dim: <= cap, and either a multiple of `unit` or the
    full extent (both layout-legal).  Prefers exact divisors (unmasked edge);
    otherwise returns a unit-aligned block and the cdiv grid masks the edge."""
    if extent <= cap:
        return extent
    cap_aligned = max((cap // unit) * unit, unit)
    d = _largest_divisor_multiple(extent, unit, cap_aligned)
    return d if d is not None else cap_aligned


def _choose_blocks(rows, lanes, itemsize, n_imgs, row_unit):
    budget = _vmem_budget_bytes()
    # Pipelined footprint = n_imgs * (in + out) * double-buffer * block_bytes.
    block_budget = max(budget // (4 * n_imgs), row_unit * _LANE_UNIT * itemsize)
    block_target = min(_BLOCK_TARGET_BYTES, block_budget)

    # lane_cap guarantees that even the minimum row block (one packed sublane
    # tile) stays within block_target -> footprint can never exceed the budget.
    lane_cap = max(min(_LANE_TARGET_BYTES // itemsize,
                       block_target // (row_unit * itemsize)), _LANE_UNIT)
    lane_block = _pick_block(lanes, _LANE_UNIT, lane_cap)

    row_cap = max(block_target // (lane_block * itemsize), 1)
    row_block = _pick_block(rows, row_unit, row_cap)

    # v7x megacore: make sure the all-"parallel" grid has >= 2 steps so both
    # TensorCores get work.  Neutral on single-core v5e/v6e.
    n_steps = pl.cdiv(rows, row_block) * pl.cdiv(lanes, lane_block)
    if n_steps < _MIN_GRID_STEPS:
        if rows >= 2 * row_unit:
            row_block = _round_up(pl.cdiv(rows, _MIN_GRID_STEPS), row_unit)
        elif lanes >= 2 * _LANE_UNIT:
            lane_block = _round_up(pl.cdiv(lanes, _MIN_GRID_STEPS), _LANE_UNIT)
    return row_block, lane_block


def _make_normalize_kernel(n_imgs, row_block):
    def kernel(*refs):
        scale_ref, bias_ref = refs[0], refs[1]
        x_refs = refs[2:2 + n_imgs]
        o_refs = refs[2 + n_imgs:]
        # scale/bias are resident (DMA'd once for the whole call); slice the
        # rows belonging to the current row-block.
        r0 = pl.multiple_of(pl.program_id(0) * row_block, row_block)
        scale = scale_ref[pl.ds(r0, row_block), :]   # f32 (row_block, 1)
        bias = bias_ref[pl.ds(r0, row_block), :]     # f32 (row_block, 1)
        for x_ref, o_ref in zip(x_refs, o_refs):
            # FMA in f32 (exact affine even for bf16 images); the kernel is
            # HBM-bound so the extra VALU work is free.
            x = x_ref[...].astype(jnp.float32)
            o_ref[...] = (x * scale + bias).astype(o_ref.dtype)
    return kernel


def normalize_images(imgs, mean, std, inplace=False):
    """Normalize a tuple of same-shaped CHW / NCHW images in one pallas_call."""
    imgs = tuple(imgs)
    n_imgs = len(imgs)
    orig_shape = imgs[0].shape
    dtype = imgs[0].dtype

    if len(orig_shape) == 4:
        n, c, h, w = orig_shape
    elif len(orig_shape) == 3:
        c, h, w = orig_shape
        n = 1
    else:
        raise ValueError(f"expected CHW or NCHW image, got shape {orig_shape}")

    rows, lanes = n * c, h * w
    itemsize = jnp.dtype(dtype).itemsize
    row_unit = _row_unit(itemsize)

    row_block, lane_block = _choose_blocks(rows, lanes, itemsize, n_imgs, row_unit)
    grid = (pl.cdiv(rows, row_block), pl.cdiv(lanes, lane_block))
    rows_pad = grid[0] * row_block   # pad scale/bias so in-kernel slices stay in-bounds

    # Per-channel affine computed ONCE in f32 (the division happens here, not
    # per pixel): scale = 1/std, bias = -mean/std; kernel does x*scale + bias.
    mean_c = jnp.broadcast_to(jnp.asarray(mean, jnp.float32).reshape(-1), (c,))
    std_c = jnp.broadcast_to(jnp.asarray(std, jnp.float32).reshape(-1), (c,))
    scale_rows = jnp.tile(1.0 / std_c, n)
    bias_rows = jnp.tile(-mean_c / std_c, n)
    if rows_pad > rows:
        scale_rows = jnp.pad(scale_rows, (0, rows_pad - rows), constant_values=1.0)
        bias_rows = jnp.pad(bias_rows, (0, rows_pad - rows))
    scale_rows = scale_rows.reshape(rows_pad, 1)
    bias_rows = bias_rows.reshape(rows_pad, 1)

    img_spec = pl.BlockSpec((row_block, lane_block), lambda i, j: (i, j))
    vec_spec = pl.BlockSpec((rows_pad, 1), lambda i, j: (0, 0))   # resident, one DMA

    # Free reshape: NCHW is contiguous, so (N*C, H*W) is a metadata-only view.
    flat_imgs = [img.reshape(rows, lanes) for img in imgs]

    block_bytes = row_block * lane_block * itemsize
    footprint = (4 * n_imgs * block_bytes
                 + 2 * _round_up(rows_pad, 8) * _LANE_UNIT * 4)
    # Footprint is budget-capped (<=16 MiB); 32 MiB scoped limit is legal on
    # every generation (v5e default is only 16 MiB, so set it explicitly).
    vmem_limit = int(min(48 << 20, max(32 << 20, footprint + (8 << 20))))

    cost = pl.CostEstimate(
        flops=2 * n_imgs * rows * lanes,
        transcendentals=0,
        bytes_accessed=2 * n_imgs * rows * lanes * itemsize + 2 * rows_pad * 4,
    )

    # inplace=True: outputs reuse the input HBM buffers (no fresh allocations).
    aliases = {2 + t: t for t in range(n_imgs)} if inplace else {}

    outs = pl.pallas_call(
        _make_normalize_kernel(n_imgs, row_block),
        out_shape=tuple(
            jax.ShapeDtypeStruct((rows, lanes), dtype) for _ in range(n_imgs)
        ),
        grid=grid,
        in_specs=[vec_spec, vec_spec] + [img_spec] * n_imgs,
        out_specs=tuple(img_spec for _ in range(n_imgs)),
        input_output_aliases=aliases,
        compiler_params=pltpu.CompilerParams(
            dimension_semantics=("parallel", "parallel"),
            vmem_limit_bytes=vmem_limit,
        ),
        cost_estimate=cost,
    )(scale_rows, bias_rows, *flat_imgs)

    if not isinstance(outs, (tuple, list)):
        outs = (outs,)
    return tuple(o.reshape(orig_shape) for o in outs)


class Normalize:
    """Pallas equivalent of the PyTorch Normalize transform on an image pair."""

    def __init__(self, mean, std, inplace=False):
        self.mean = mean
        self.std = std
        self.inplace = inplace  # with JAX semantics: alias outputs onto input buffers

    def __call__(self, img_pair):
        imgs = tuple(img_pair)
        if not imgs:
            return ()
        same = all(
            im.shape == imgs[0].shape and im.dtype == imgs[0].dtype
            for im in imgs[1:]
        )
        if same:
            # Fused path: one pallas_call for the whole pair.
            return normalize_images(imgs, self.mean, self.std, inplace=self.inplace)
        # Fallback: differing shapes/dtypes -> one call per image.
        return tuple(
            normalize_images((im,), self.mean, self.std, inplace=self.inplace)[0]
            for im in imgs
        )

    def __repr__(self):
        return self.__class__.__name__ + "(mean={0}, std={1})".format(
            self.mean, self.std
        )


if __name__ == "__main__":
    key = jax.random.PRNGKey(0)
    k1, k2 = jax.random.split(key)

    N, C, H, W = 2, 4, 16, 16  # small NCHW shapes
    img_a = jax.random.uniform(k1, (N, C, H, W), dtype=jnp.float32)
    img_b = jax.random.uniform(k2, (N, C, H, W), dtype=jnp.float32)

    # Deterministic per-channel statistics (module __init__ args).
    mean = [0.485, 0.456, 0.406, 0.5][:C]
    std = [0.229, 0.224, 0.225, 0.25][:C]

    norm = Normalize(mean, std)
    out_pair = norm((img_a, img_b))
    out_pair = tuple(jax.block_until_ready(o) for o in out_pair)

    # Correctness check against a plain-JAX reference.
    mean_arr = jnp.asarray(mean, jnp.float32).reshape(1, C, 1, 1)
    std_arr = jnp.asarray(std, jnp.float32).reshape(1, C, 1, 1)
    for out, img in zip(out_pair, (img_a, img_b)):
        ref = (img - mean_arr) / std_arr
        assert out.shape == img.shape and out.dtype == img.dtype
        assert jnp.max(jnp.abs(out - ref)) < 1e-5

    # Also exercise the buffer-aliasing (inplace=True) path.
    out_inplace = Normalize(mean, std, inplace=True)((img_a, img_b))
    out_inplace = tuple(jax.block_until_ready(o) for o in out_inplace)
    for out, ref_out in zip(out_inplace, out_pair):
        assert jnp.max(jnp.abs(out - ref_out)) < 1e-6

    print("KERNEL_OK")
</pallas_src>

<mosaic_0001>
module attributes {stable_mosaic.version = 11 : i64} {
  func.func @kernel(%arg0: i32, %arg1: i32, %arg2: memref<8x1xf32, #tpu.memory_space<vmem>>, %arg3: memref<8x1xf32, #tpu.memory_space<vmem>>, %arg4: memref<8x128xf32, #tpu.memory_space<vmem>>, %arg5: memref<8x128xf32, #tpu.memory_space<vmem>>, %arg6: memref<8x128xf32, #tpu.memory_space<vmem>>, %arg7: memref<8x128xf32, #tpu.memory_space<vmem>>) attributes {dimension_semantics = [#tpu.dimension_semantics<parallel>, #tpu.dimension_semantics<parallel>], iteration_bounds = array<i64: 1, 2>, scalar_prefetch = 0 : i64, scratch_operands = 0 : i64, tpu.core_type = #tpu.core_type<tc>, window_params = [{pipeline_mode = #tpu.pipeline_mode<synchronous>, transform_indices = @transform_0, window_bounds = array<i64: 8, 1>}, {pipeline_mode = #tpu.pipeline_mode<synchronous>, transform_indices = @transform_1, window_bounds = array<i64: 8, 1>}, {transform_indices = @transform_2, window_bounds = array<i64: 8, 128>}, {transform_indices = @transform_3, window_bounds = array<i64: 8, 128>}, {transform_indices = @transform_4, window_bounds = array<i64: 8, 128>}, {transform_indices = @transform_5, window_bounds = array<i64: 8, 128>}]} {
    %c8_i32 = arith.constant 8 : i32
    %0 = arith.muli %arg0, %c8_i32 : i32
    %1 = tpu.assume_multiple %0, 8 : i32
    %2 = arith.index_cast %1 : i32 to index
    %c0 = arith.constant 0 : index
    %3 = vector.load %arg2[%2, %c0] : memref<8x1xf32, #tpu.memory_space<vmem>>, vector<8x1xf32>
    %4 = arith.index_cast %1 : i32 to index
    %c0_0 = arith.constant 0 : index
    %5 = vector.load %arg3[%4, %c0_0] : memref<8x1xf32, #tpu.memory_space<vmem>>, vector<8x1xf32>
    %c0_1 = arith.constant 0 : index
    %c0_2 = arith.constant 0 : index
    %6 = vector.load %arg4[%c0_1, %c0_2] : memref<8x128xf32, #tpu.memory_space<vmem>>, vector<8x128xf32>
    %7 = vector.broadcast %3 : vector<8x1xf32> to vector<8x128xf32>
    %8 = arith.mulf %6, %7 : vector<8x128xf32>
    %9 = vector.broadcast %5 : vector<8x1xf32> to vector<8x128xf32>
    %10 = arith.addf %8, %9 : vector<8x128xf32>
    %c0_3 = arith.constant 0 : index
    %c0_4 = arith.constant 0 : index
    %11 = vector.load %arg6[%c0_3, %c0_4] : memref<8x128xf32, #tpu.memory_space<vmem>>, vector<8x128xf32>
    tpu.vector_store %arg6[%c0_3, %c0_4], %10 {strides = array<i32>} : memref<8x128xf32, #tpu.memory_space<vmem>>, vector<8x128xf32>,
    %c0_5 = arith.constant 0 : index
    %c0_6 = arith.constant 0 : index
    %12 = vector.load %arg5[%c0_5, %c0_6] : memref<8x128xf32, #tpu.memory_space<vmem>>, vector<8x128xf32>
    %13 = vector.broadcast %3 : vector<8x1xf32> to vector<8x128xf32>
    %14 = arith.mulf %12, %13 : vector<8x128xf32>
    %15 = vector.broadcast %5 : vector<8x1xf32> to vector<8x128xf32>
    %16 = arith.addf %14, %15 : vector<8x128xf32>
    %c0_7 = arith.constant 0 : index
    %c0_8 = arith.constant 0 : index
    %17 = vector.load %arg7[%c0_7, %c0_8] : memref<8x128xf32, #tpu.memory_space<vmem>>, vector<8x128xf32>
    tpu.vector_store %arg7[%c0_7, %c0_8], %16 {strides = array<i32>} : memref<8x128xf32, #tpu.memory_space<vmem>>, vector<8x128xf32>,
    return
  }
  func.func @transform_0(%arg0: i32, %arg1: i32) -> (i32, i32) {
    %c0_i32 = arith.constant 0 : i32
    %c0_i32_0 = arith.constant 0 : i32
    %c0_i32_1 = arith.constant 0 : i32
    return %c0_i32, %c0_i32_0 : i32, i32
  }
  func.func @transform_1(%arg0: i32, %arg1: i32) -> (i32, i32) {
    %c0_i32 = arith.constant 0 : i32
    %c0_i32_0 = arith.constant 0 : i32
    %c0_i32_1 = arith.constant 0 : i32
    return %c0_i32, %c0_i32_0 : i32, i32
  }
  func.func @transform_2(%arg0: i32, %arg1: i32) -> (i32, i32) {
    %c0_i32 = arith.constant 0 : i32
    return %arg0, %arg1 : i32, i32
  }
  func.func @transform_3(%arg0: i32, %arg1: i32) -> (i32, i32) {
    %c0_i32 = arith.constant 0 : i32
    return %arg0, %arg1 : i32, i32
  }
  func.func @transform_4(%arg0: i32, %arg1: i32) -> (i32, i32) {
    %c0_i32 = arith.constant 0 : i32
    return %arg0, %arg1 : i32, i32
  }
  func.func @transform_5(%arg0: i32, %arg1: i32) -> (i32, i32) {
    %c0_i32 = arith.constant 0 : i32
    return %arg0, %arg1 : i32, i32
  }
}

</mosaic_0001>

<bundles_post_ra>
// kernel: tpu_custom_call.1
= control target key start
LH: loop header
LB: loop body
LE: loop exit
PB: predicated region body
PF: predicated region fallthrough
CT: control target
= control target key end

     0   :  { %11 = vsyncpa [#allocation3], 0  ;;  %s949_s0 = inlined_call_operand.vmem [shape: f32[8,1], index: 0, kind: input, shape index: {}]   ;;  %s950_s1 = inlined_call_operand.vmem [shape: f32[8,1], index: 1, kind: input, shape index: {}]   ;;  %s951_s2 = inlined_call_operand.vmem [shape: f32[8,256], index: 2, kind: input, shape index: {}]   ;;  %s952_s3 = inlined_call_operand.hbm [shape: f32[8,256], index: 3, kind: input, shape index: {}]   ;;  %s953_s4 = inlined_call_operand.hbm [shape: f32[8,256], index: 4, kind: output, shape index: {0}]   ;;  %s954_s5 = inlined_call_operand.hbm [shape: f32[8,256], index: 5, kind: output, shape index: {1}]  }
   0x1   :  { %13 = vsyncpa [#allocation3 + $0x1], 0 }
   0x2   :  { %14 = vsyncpa [#allocation4], 0 }
   0x3   :  { %16 = vsyncpa [#allocation4 + $0x1], 0 }
   0x4   :  { %17 = vsyncpa [#allocation7], 0 }
   0x5   :  { %19 = vsyncpa [#allocation7 + $0x1], 0  ;;  %s759_s18 = smov 0   ;;  %s761_s19 = smov 0  }
   0x6   :  { %s763_s20 = smov 0   ;;  %s765_s21 = smov 0  }
   0x7   :  { %s767_s22 = smov 0   ;;  %s769_s23 = smov 0  }
   0x8 LB: > { %s499_s24 = sadd.s32 4294967295, %s723_s23   ;;  %s500_s25 = sadd.s32 4294967294, %s723_s23   ;;  %s723_s23 = sphi %s769_s23, %s25_s23   ;;  %s719_s22 = sphi %s767_s22, %s966_s22   ;;  %s715_s21 = sphi %s765_s21, %s965_s21   ;;  %s711_s20 = sphi %s763_s20, %s964_s20   ;;  %s707_s19 = sphi %s761_s19, %s963_s19   ;;  %s703_s18 = sphi %s759_s18, %s962_s18  }
   0x9   : > { %s34_s26 = sadd.s32 1, %s719_s22  ;;  %s116_s27 = sadd.s32 1, %s711_s20 }
   0xa   : > { %p35_p0 = scmp.ge.s32.totalorder %s34_s26, 2  ;;  %p123_p1 = scmp.ne.s32.totalorder %s711_s20, %s707_s19 }
   0xb   : > { %p124_p2 = scmp.eq.s32.totalorder %s723_s23, 0  ;;  %p129_p3 = scmp.ne.s32.totalorder %s707_s19, %s703_s18 }
   0xc   : > { %s968_s26 = smov (%p35_p0, %s34_s26), 0  ;;  %p130_p5 = scmp.eq.s32.totalorder %s499_s24, 0 }
   0xd   : > { %p800_p4 = por %p124_p2, %p123_p1  ;;  %s112_s29 = ssub.s32 %s719_s22, %s968_s26 }
   0xe   : > { %p155_p6 = scmp.eq.s32.totalorder %s499_s24, 1  ;;  %p114_p7 = scmp.eq.s32.totalorder %s112_s29, 0 }
   0xf   : > { %p806_p8 = por %p130_p5, %p129_p3  ;;  %p161_p10 = scmp.eq.s32.totalorder %s500_s25, 1 }
  0x10   : > { %p810_p9 = por %p155_p6, %p123_p1  ;;  %p533_p13 = scmp.lt.s32.totalorder %s723_s23, 2 }
  0x11   : > { %s815_s7 = scalar_select %p114_p7, %s711_s20, %s116_s27  }
  0x12   : > { %p817_p11 = por %p161_p10, %p129_p3  ;;  %s226_s9 = sand.u32 1, %s711_s20  }
  0x13   : > { %s503_s10 = sshll.u32 %s226_s9, 3  ;;  %s504_s11 = sshll.u32 %s719_s22, 7 }
  0x14   : > { %s958_s8 = scalar_select %p817_p11, 1, 0 }
  0x15   : > { %s237_s14 = scalar_lea.hbm %s952_s3, %s504_s11  ;;  %s230_s15 = scalar_lea.vmem [#allocation2], %s503_s10 }
  0x16   : > { %s239_s16 = sshll.u32 %s230_s15, 4  ;;  %p830_p0 = pnand %p533_p13, %p800_p4  ;;  %s240_s16 = int_to_ptr.vmem [resolvable:$true] %s239_s16 }
  0x17   : > { %p505_p1 = scmp.ge.s32.totalorder %s723_s23, 1  ;;  %p244_p2 = scmp.lt.s32.totalorder %s723_s23, 3 }
  0x18   : > { %s227_s24 = scalar_lea.sflag [#allocation3], %s226_s9  ;;  %p587_p3 = pneg %p830_p0 }
  0x19   : > { %s598_s25 = scalar_lea.vmem %s240_s16, 128  ;;  %s725_s27 = smov [#allocation2]  }
  0x1a   : > { %p599_p5 = scmp.ne.s32.totalorder %s240_s16, %s598_s25  ;;  %s603_s29 = sshll.u32 %s725_s27, 4  ;;  %s604_s29 = int_to_ptr.vmem [resolvable:$false] %s603_s29 }
  0x1b   : > { %s605_s10 = scalar_lea.vmem %s604_s29, 256  ;;  %p606_p10 = scmp.lt.s32.totalorder %s240_s16, %s604_s29 }
  0x1c   : > { %p601_p6 = pnand %p599_p5, %p587_p3  ;;  %p607_p12 = scmp.lt.s32.totalorder %s605_s10, %s598_s25 }
  0x1e   : > { %p602_p7 = pneg %p601_p6  ;;  %p608_p4 = por %p607_p12, %p606_p10 }
  0x20   : > { %p609_p13 = pnand %p608_p4, %p602_p7 }
  0x22   : > { %612 = shalt.err (!%p609_p13)
}
  0x23   : > { %525 = dma.hbm_to_vmem [thread:$0]  (!%p830_p0), %s237_s14, 128, %s240_s16, %s227_s24  }
  0x24   : > { %p245_p11 = pnand %p505_p1, %p244_p2 }
  0x25   : > { %s845_s28 = sand.u32 (!%p245_p11), 1, %s707_s19  }
  0x26   : > { %248 = sbr.rel (%p245_p11) target bundleno = 211 (0xd3), region = 36  ;;  %s848_s9 = sshll.u32 (!%p245_p11), %s845_s28, 3 }
  0x27   : > { %s251_s11 = scalar_lea.sflag (!%p245_p11), [#allocation3], %s845_s28  ;;  %s254_s12 = scalar_lea.vmem (!%p245_p11), [#allocation2], %s848_s9 }
  0x2b   : > { %690 = dma.done.wait (%p806_p8), %s251_s11, 128  }
  0x2c   : > { %692 = vsyncadd (%p806_p8), %s251_s11, 4294967168  ;;  %v726_v0 = vmov 0   ;;  %v304_v1 = vld [vmem:[%s949_s0] sm:$0xff]  ;;  %p296_p11 = scmp.lt.s32.totalorder %s715_s21, 1  ;;  %v321_v4 = vld [vmem:[%s254_s12] sm:$0xff]  ;;  %s512_s29 = sshll.u32 %s715_s21, 7 }
  0x2d   : > { %584 = vset.pattern.permute.xlu0 %v726_v0  ;;  %v306_v2 = vld [vmem:[%s950_s1] sm:$0xff]  ;;  %s286_s10 = scalar_lea.vmem [#allocation5], %s848_s9  ;;  %s293_s13 = scalar_lea.vmem [#allocation6], %s848_s9 }
  0x2e   : > { %310 = vperm.xlu0 %584, %v304_v1   ;;  %s297_s30 = scalar_select %p296_p11, %s715_s21, 1 }
  0x2f   : > { %s346_s11 = sshll.u32 %s286_s10, 4  ;;  %s361_s14 = sshll.u32 %s293_s13, 4  ;;  %s875_s11 = int_to_ptr.vmem [resolvable:$true] %s346_s11  ;;  %s882_s14 = int_to_ptr.vmem [resolvable:$true] %s361_s14 }
  0x30   : > { %s509_s17 = sshll.u32 %s297_s30, 3  ;;  %s873_s30 = scalar_lea.hbm %s953_s4, %s512_s29 }
  0x31   : > { %s301_s27 = scalar_lea.vmem %s951_s2, %s509_s17  ;;  %s880_s17 = scalar_lea.hbm %s954_s5, %s512_s29 }
  0x32   : > { %316 = vperm.xlu0 %584, %v306_v2   ;;  %v307_v3 = vld [vmem:[%s301_s27] sm:$0xff]  ;;  %s326_s9 = scalar_lea.sflag [#allocation4], %s845_s28  ;;  %s613_s24 = scalar_lea.vmem %s875_s11, 128 }
  0x33   : > { %p614_p8 = scmp.ne.s32.totalorder %s875_s11, %s613_s24  ;;  %s727_s25 = smov [#allocation5]  }
  0x34   : > { %s617_s27 = sshll.u32 %s727_s25, 4  ;;  %s618_s27 = int_to_ptr.vmem [resolvable:$false] %s617_s27 }
  0x35   : > { %p615_p12 = pnand %p614_p8, %p810_p9  ;;  %s619_s15 = scalar_lea.vmem %s618_s27, 256 }
  0x36   : > { %p620_p1 = scmp.lt.s32.totalorder %s875_s11, %s618_s27  ;;  %p621_p2 = scmp.lt.s32.totalorder %s619_s15, %s613_s24 }
  0x37   : > { %p616_p0 = pneg %p615_p12 }
  0x38   : > { %p622_p3 = por %p621_p2, %p620_p1 }
  0x3a   : > { %p623_p5 = pnand %p622_p3, %p616_p0 }
  0xa9   : > { %v311_v5 = vpop.permute.xlu0 %310 }
  0xaa   : > { %v313_v6 = vmul.f32 %v311_v5, %v307_v3  ;;  %v322_v7 = vmul.f32 %v321_v4, %v311_v5 }
  0xad   : > { %v317_v8 = vpop.permute.xlu0 %316 }
  0xae   : > { %v319_v9 = vadd.f32 %v317_v8, %v313_v6  ;;  %v323_v10 = vadd.f32 %v322_v7, %v317_v8 }
  0xb0   : > { %320 = vst [vmem:[%s286_s10] sm:$0xff] %v319_v9  ;;  %324 = vst [vmem:[%s293_s13] sm:$0xff] %v323_v10 }
  0xb1   : > { %626 = shalt.err (!%p623_p5)
}
  0xb2   : > { %s627_s29 = scalar_lea.hbm %s873_s30, 128  ;;  %s631_s16 = scalar_lea.hbm %s953_s4, 256 }
  0xb3   : > { %p628_p6 = scmp.ne.s32.totalorder %s873_s30, %s627_s29  ;;  %p632_p4 = scmp.lt.s32.totalorder %s873_s30, %s953_s4 }
  0xb4   : > { %p633_p13 = scmp.lt.s32.totalorder %s631_s16, %s627_s29 }
  0xb5   : > { %p629_p7 = pnand %p628_p6, %p810_p9 }
  0xb6   : > { %p634_p11 = por %p633_p13, %p632_p4 }
  0xb7   : > { %p630_p10 = pneg %p629_p7 }
  0xb9   : > { %p635_p8 = pnand %p634_p11, %p630_p10 }
  0xbb   : > { %638 = shalt.err (!%p635_p8)
}
  0xbc   : > { %518 = dma.vmem_to_hbm [thread:$0]  (%p810_p9), %s875_s11, 128, %s873_s30, %s326_s9  }
  0xbd   : > { %s331_s24 = scalar_lea.sflag [#allocation7], %s845_s28  ;;  %s639_s25 = scalar_lea.vmem %s882_s14, 128 }
  0xbe   : > { %p640_p12 = scmp.ne.s32.totalorder %s882_s14, %s639_s25  ;;  %s728_s27 = smov [#allocation6]  }
  0xbf   : > { %s643_s15 = sshll.u32 %s728_s27, 4  ;;  %s644_s15 = int_to_ptr.vmem [resolvable:$false] %s643_s15 }
  0xc0   : > { %p641_p0 = pnand %p640_p12, %p810_p9  ;;  %s645_s29 = scalar_lea.vmem %s644_s15, 256 }
  0xc1   : > { %p646_p2 = scmp.lt.s32.totalorder %s882_s14, %s644_s15  ;;  %p647_p3 = scmp.lt.s32.totalorder %s645_s29, %s639_s25 }
  0xc2   : > { %p642_p1 = pneg %p641_p0 }
  0xc3   : > { %p648_p5 = por %p647_p3, %p646_p2 }
  0xc5   : > { %p649_p6 = pnand %p648_p5, %p642_p1 }
  0xc7   : > { %652 = shalt.err (!%p649_p6)
}
  0xc8   : > { %s653_s11 = scalar_lea.hbm %s880_s17, 128  ;;  %s657_s9 = scalar_lea.hbm %s954_s5, 256 }
  0xc9   : > { %p654_p7 = scmp.ne.s32.totalorder %s880_s17, %s653_s11  ;;  %p658_p13 = scmp.lt.s32.totalorder %s880_s17, %s954_s5 }
  0xca   : > { %p659_p11 = scmp.lt.s32.totalorder %s657_s9, %s653_s11 }
  0xcb   : > { %p655_p10 = pnand %p654_p7, %p810_p9 }
  0xcc   : > { %p660_p8 = por %p659_p11, %p658_p13 }
  0xcd   : > { %p656_p4 = pneg %p655_p10 }
  0xcf   : > { %p661_p12 = pnand %p660_p8, %p656_p4 }
  0xd1   : > { %664 = shalt.err (!%p661_p12)
}
  0xd2   : > { %519 = dma.vmem_to_hbm [thread:$0]  (%p810_p9), %s882_s14, 128, %s880_s17, %s331_s24  }
  0xd3 PF: > { %s373_s16 = sand.u32 1, %s703_s18   ;;  %p960_p0 = scmp.ne.s32.totalorder %s958_s8, 0 }
  0xd4   : > { %p961_p1 = scmp.ge.s32.totalorder %s723_s23, 2  ;;  %s374_s12 = scalar_lea.sflag [#allocation4], %s373_s16 }
  0xd6   : > { %p527_p2 = pnand %p961_p1, %p960_p0 }
  0xd8   : > { %p528_p3 = pneg %p527_p2 }
  0xda   : > { %694 = dma.done.wait (%p528_p3), %s374_s12, 128  }
  0xdb   : > { %696 = vsyncadd (%p528_p3), %s374_s12, 4294967168  ;;  %s383_s21 = scalar_lea.sflag [#allocation7], %s373_s16 }
  0xdc   : > { %698 = dma.done.wait (%p528_p3), %s383_s21, 128  }
  0xdd   : > { %700 = vsyncadd (%p528_p3), %s383_s21, 4294967168  ;;  %s25_s23 = sadd.s32 1, %s723_s23   ;;  %s962_s18 = smov %s707_s19 }
  0xde   : > { %p22_p5 = scmp.ge.s32.totalorder %s25_s23, 4   ;;  %s963_s19 = smov %s711_s20 }
  0xdf   : > { %s964_s20 = smov %s815_s7  ;;  %s965_s21 = smov %s719_s22 }
  0xe0   : > { %s966_s22 = smov %s968_s26  ;;  %24 = sbr.rel (!%p22_p5) target bundleno = 8 (0x8), region = 103 }
  0xe5   :  { %388 = vsyncpa [#allocation3], 1 }
  0xe6   :  { %390 = vsyncpa [#allocation3 + $0x1], 1 }
  0xe7   :  { %391 = vsyncpa [#allocation4], 1 }
  0xe8   :  { %393 = vsyncpa [#allocation4 + $0x1], 1 }
  0xe9   :  { %394 = vsyncpa [#allocation7], 1 }
  0xea   :  { %396 = vsyncpa [#allocation7 + $0x1], 1 }

</bundles_post_ra>
